<compile_context>
chip_gen: v7x
topology: tpu7x:2x2x1
jax: 0.10.0
libtpu: 0.0.40
codegen_flags: <defaults>
</compile_context>

<pallas_src>
import jax
import jax.numpy as jnp
from jax.experimental import pallas as pl
from jax.experimental.pallas import tpu as pltpu

_H1, _H2 = 32, 16
_LANE = 128


def _round_up(n, m):
    return ((n + m - 1) // m) * m


def _dqn_kernel(x_ref, w1_ref, b1_ref, w2_ref, b2_ref, w3_ref, b3_ref, o_ref):
    # Hot path: three MXU matmuls (f32 accumulation) + bias add + ReLU on VPU.
    x = x_ref[...]
    h1 = jnp.dot(x, w1_ref[...], preferred_element_type=jnp.float32) + b1_ref[...]
    h1 = jnp.maximum(h1, 0.0)
    h2 = (
        jnp.dot(h1.astype(w2_ref.dtype), w2_ref[...], preferred_element_type=jnp.float32)
        + b2_ref[...]
    )
    h2 = jnp.maximum(h2, 0.0)
    h3 = (
        jnp.dot(h2.astype(w3_ref.dtype), w3_ref[...], preferred_element_type=jnp.float32)
        + b3_ref[...]
    )
    o_ref[...] = h3.astype(o_ref.dtype)


def init_params(key, state_size, action_size):
    """Deterministic init mimicking nn.Linear default: U(-1/sqrt(fan_in), 1/sqrt(fan_in))."""
    ks = jax.random.split(key, 6)

    def linear_init(kw, kb, fan_in, fan_out):
        bound = 1.0 / jnp.sqrt(jnp.float32(fan_in))
        w = jax.random.uniform(kw, (fan_out, fan_in), jnp.float32, -bound, bound)
        b = jax.random.uniform(kb, (fan_out,), jnp.float32, -bound, bound)
        return w, b

    w1, b1 = linear_init(ks[0], ks[1], state_size, _H1)
    w2, b2 = linear_init(ks[2], ks[3], _H1, _H2)
    w3, b3 = linear_init(ks[4], ks[5], _H2, action_size)
    return {"w1": w1, "b1": b1, "w2": w2, "b2": b2, "w3": w3, "b3": b3}


def prepare_params(params, compute_dtype=jnp.float32):
    """One-time layout work, kept OUT of the per-call hot path:
      - transpose PyTorch-style (out, in) weights to (in, out)
      - zero-pad the last layer to a lane-dense 128-wide output
      - cast streamed weights to compute_dtype (f32, or bf16 on v6e/v7x)
      - biases stay f32 (added to the f32 accumulator).
    """
    w1t = params["w1"].T.astype(compute_dtype)              # [S, 32]
    w2t = params["w2"].T.astype(compute_dtype)              # [32, 16]
    w3t_raw = params["w3"].T                                 # [16, A]
    action_size = w3t_raw.shape[1]
    out_pad = _round_up(max(action_size, _LANE), _LANE)
    w3t = jnp.pad(w3t_raw, ((0, 0), (0, out_pad - action_size))).astype(compute_dtype)

    b1r = params["b1"][None, :].astype(jnp.float32)          # [1, 32]
    b2r = params["b2"][None, :].astype(jnp.float32)          # [1, 16]
    b3r = jnp.pad(params["b3"], (0, out_pad - action_size))[None, :].astype(jnp.float32)

    return {
        "w1t": w1t, "b1r": b1r,
        "w2t": w2t, "b2r": b2r,
        "w3t": w3t, "b3r": b3r,
        "action_size": action_size,
        "compute_dtype": compute_dtype,
    }


def dqn_forward(x, prepared, *, tb=None):
    """x: [B, state_size]. prepared: output of prepare_params()."""
    w1t, b1r = prepared["w1t"], prepared["b1r"]
    w2t, b2r = prepared["w2t"], prepared["b2r"]
    w3t, b3r = prepared["w3t"], prepared["b3r"]
    action_size = prepared["action_size"]
    compute_dtype = prepared["compute_dtype"]

    B, S = x.shape
    out_pad = w3t.shape[1]

    # Batch tile: big sublane-dense tiles amortize per-step overhead; for tiny
    # batches use a single block (rounded up to the f32 sublane multiple of 8).
    if tb is None:
        tb = 512 if B >= 512 else _round_up(max(B, 8), 8)
    tb = min(tb, _round_up(max(B, 8), 8))
    tb = _round_up(tb, 8)
    b_pad = _round_up(B, tb)

    x = x.astype(compute_dtype)
    if b_pad != B:
        x = jnp.pad(x, ((0, b_pad - B), (0, 0)))

    grid = (b_pad // tb,)

    weight_bytes = sum(
        int(a.size) * a.dtype.itemsize for a in (w1t, b1r, w2t, b2r, w3t, b3r)
    )
    cost = pl.CostEstimate(
        flops=2 * b_pad * (S * _H1 + _H1 * _H2 + _H2 * out_pad),
        transcendentals=0,
        bytes_accessed=b_pad * S * x.dtype.itemsize
        + b_pad * out_pad * 4
        + weight_bytes,
    )

    out = pl.pallas_call(
        _dqn_kernel,
        out_shape=jax.ShapeDtypeStruct((b_pad, out_pad), jnp.float32),
        grid_spec=pl.GridSpec(
            grid=grid,
            in_specs=[
                pl.BlockSpec((tb, S), lambda i: (i, 0)),        # x: streamed per tile
                pl.BlockSpec(w1t.shape, lambda i: (0, 0)),       # weights: VMEM-resident
                pl.BlockSpec(b1r.shape, lambda i: (0, 0)),
                pl.BlockSpec(w2t.shape, lambda i: (0, 0)),
                pl.BlockSpec(b2r.shape, lambda i: (0, 0)),
                pl.BlockSpec(w3t.shape, lambda i: (0, 0)),
                pl.BlockSpec(b3r.shape, lambda i: (0, 0)),
            ],
            out_specs=pl.BlockSpec((tb, out_pad), lambda i: (i, 0)),
        ),
        compiler_params=pltpu.CompilerParams(
            dimension_semantics=("parallel",),
        ),
        cost_estimate=cost,
    )(x, w1t, b1r, w2t, b2r, w3t, b3r)

    return out[:B, :action_size]


def dqn_reference(x, params):
    h = jnp.maximum(x @ params["w1"].T + params["b1"], 0.0)
    h = jnp.maximum(h @ params["w2"].T + params["b2"], 0.0)
    return h @ params["w3"].T + params["b3"]


if __name__ == "__main__":
    key = jax.random.PRNGKey(0)
    k_param, k_x1, k_x2 = jax.random.split(key, 3)

    state_size = 4    # ToyText-style small observation
    action_size = 2

    params = init_params(k_param, state_size, action_size)
    # f32 streaming here for exact parity with the reference; on v6e/v7x pass
    # compute_dtype=jnp.bfloat16 to halve HBM traffic (f32 accumulation kept).
    prepared = prepare_params(params, compute_dtype=jnp.float32)

    # Small demo batch (single grid step).
    x_small = jax.random.normal(k_x1, (8, state_size), jnp.float32)
    out_small = jax.block_until_ready(dqn_forward(x_small, prepared))
    ref_small = dqn_reference(x_small, params)
    assert out_small.shape == (8, action_size)
    assert jnp.allclose(out_small, ref_small, atol=1e-5, rtol=1e-5), "small batch mismatch"

    # Larger, non-tile-multiple batch: exercises batch tiling + tail padding.
    x_big = jax.random.normal(k_x2, (1000, state_size), jnp.float32)
    out_big = jax.block_until_ready(dqn_forward(x_big, prepared, tb=512))
    ref_big = dqn_reference(x_big, params)
    assert out_big.shape == (1000, action_size)
    assert jnp.allclose(out_big, ref_big, atol=1e-5, rtol=1e-5), "big batch mismatch"

    print("KERNEL_OK")
</pallas_src>

<mosaic_0001>
module attributes {stable_mosaic.version = 11 : i64} {
  func.func @_dqn_kernel(%arg0: i32, %arg1: memref<8x4xf32, #tpu.memory_space<vmem>>, %arg2: memref<4x32xf32, #tpu.memory_space<vmem>>, %arg3: memref<1x32xf32, #tpu.memory_space<vmem>>, %arg4: memref<32x16xf32, #tpu.memory_space<vmem>>, %arg5: memref<1x16xf32, #tpu.memory_space<vmem>>, %arg6: memref<16x128xf32, #tpu.memory_space<vmem>>, %arg7: memref<1x128xf32, #tpu.memory_space<vmem>>, %arg8: memref<8x128xf32, #tpu.memory_space<vmem>>) attributes {dimension_semantics = [#tpu.dimension_semantics<parallel>], iteration_bounds = array<i64: 1>, scalar_prefetch = 0 : i64, scratch_operands = 0 : i64, tpu.core_type = #tpu.core_type<tc>, window_params = [{transform_indices = @transform_0, window_bounds = array<i64: 8, 4>}, {pipeline_mode = #tpu.pipeline_mode<synchronous>, transform_indices = @transform_1, window_bounds = array<i64: 4, 32>}, {pipeline_mode = #tpu.pipeline_mode<synchronous>, transform_indices = @transform_2, window_bounds = array<i64: 1, 32>}, {pipeline_mode = #tpu.pipeline_mode<synchronous>, transform_indices = @transform_3, window_bounds = array<i64: 32, 16>}, {pipeline_mode = #tpu.pipeline_mode<synchronous>, transform_indices = @transform_4, window_bounds = array<i64: 1, 16>}, {pipeline_mode = #tpu.pipeline_mode<synchronous>, transform_indices = @transform_5, window_bounds = array<i64: 16, 128>}, {pipeline_mode = #tpu.pipeline_mode<synchronous>, transform_indices = @transform_6, window_bounds = array<i64: 1, 128>}, {transform_indices = @transform_7, window_bounds = array<i64: 8, 128>}]} {
    %c0 = arith.constant 0 : index
    %c0_0 = arith.constant 0 : index
    %0 = vector.load %arg1[%c0, %c0_0] : memref<8x4xf32, #tpu.memory_space<vmem>>, vector<8x4xf32>
    %c0_1 = arith.constant 0 : index
    %c0_2 = arith.constant 0 : index
    %1 = vector.load %arg2[%c0_1, %c0_2] : memref<4x32xf32, #tpu.memory_space<vmem>>, vector<4x32xf32>
    %cst = arith.constant dense<0.000000e+00> : vector<8x32xf32>
    %2 = tpu.matmul %0, %1, %cst {dimension_numbers = #tpu.dot_dimension_numbers<[1], [0], [0], [1], [0, 0, 1, 1], [], []>} : vector<8x4xf32>, vector<4x32xf32>, vector<8x32xf32> -> vector<8x32xf32>
    %c0_3 = arith.constant 0 : index
    %c0_4 = arith.constant 0 : index
    %3 = vector.load %arg3[%c0_3, %c0_4] : memref<1x32xf32, #tpu.memory_space<vmem>>, vector<1x32xf32>
    %4 = vector.broadcast %3 : vector<1x32xf32> to vector<8x32xf32>
    %5 = arith.addf %2, %4 : vector<8x32xf32>
    %cst_5 = arith.constant 0.000000e+00 : f32
    %6 = vector.broadcast %cst_5 : f32 to vector<8x32xf32>
    %7 = arith.maximumf %5, %6 : vector<8x32xf32>
    %c0_6 = arith.constant 0 : index
    %c0_7 = arith.constant 0 : index
    %8 = vector.load %arg4[%c0_6, %c0_7] : memref<32x16xf32, #tpu.memory_space<vmem>>, vector<32x16xf32>
    %cst_8 = arith.constant dense<0.000000e+00> : vector<8x16xf32>
    %9 = tpu.matmul %7, %8, %cst_8 {dimension_numbers = #tpu.dot_dimension_numbers<[1], [0], [0], [1], [0, 0, 1, 1], [], []>} : vector<8x32xf32>, vector<32x16xf32>, vector<8x16xf32> -> vector<8x16xf32>
    %c0_9 = arith.constant 0 : index
    %c0_10 = arith.constant 0 : index
    %10 = vector.load %arg5[%c0_9, %c0_10] : memref<1x16xf32, #tpu.memory_space<vmem>>, vector<1x16xf32>
    %11 = vector.broadcast %10 : vector<1x16xf32> to vector<8x16xf32>
    %12 = arith.addf %9, %11 : vector<8x16xf32>
    %cst_11 = arith.constant 0.000000e+00 : f32
    %13 = vector.broadcast %cst_11 : f32 to vector<8x16xf32>
    %14 = arith.maximumf %12, %13 : vector<8x16xf32>
    %c0_12 = arith.constant 0 : index
    %c0_13 = arith.constant 0 : index
    %15 = vector.load %arg6[%c0_12, %c0_13] : memref<16x128xf32, #tpu.memory_space<vmem>>, vector<16x128xf32>
    %cst_14 = arith.constant dense<0.000000e+00> : vector<8x128xf32>
    %16 = tpu.matmul %14, %15, %cst_14 {dimension_numbers = #tpu.dot_dimension_numbers<[1], [0], [0], [1], [0, 0, 1, 1], [], []>} : vector<8x16xf32>, vector<16x128xf32>, vector<8x128xf32> -> vector<8x128xf32>
    %c0_15 = arith.constant 0 : index
    %c0_16 = arith.constant 0 : index
    %17 = vector.load %arg7[%c0_15, %c0_16] : memref<1x128xf32, #tpu.memory_space<vmem>>, vector<1x128xf32>
    %18 = vector.broadcast %17 : vector<1x128xf32> to vector<8x128xf32>
    %19 = arith.addf %16, %18 : vector<8x128xf32>
    %c0_17 = arith.constant 0 : index
    %c0_18 = arith.constant 0 : index
    %20 = vector.load %arg8[%c0_17, %c0_18] : memref<8x128xf32, #tpu.memory_space<vmem>>, vector<8x128xf32>
    tpu.vector_store %arg8[%c0_17, %c0_18], %19 {strides = array<i32>} : memref<8x128xf32, #tpu.memory_space<vmem>>, vector<8x128xf32>,
    return
  }
  func.func @transform_0(%arg0: i32) -> (i32, i32) {
    %c0_i32 = arith.constant 0 : i32
    %c0_i32_0 = arith.constant 0 : i32
    return %arg0, %c0_i32 : i32, i32
  }
  func.func @transform_1(%arg0: i32) -> (i32, i32) {
    %c0_i32 = arith.constant 0 : i32
    %c0_i32_0 = arith.constant 0 : i32
    %c0_i32_1 = arith.constant 0 : i32
    return %c0_i32, %c0_i32_0 : i32, i32
  }
  func.func @transform_2(%arg0: i32) -> (i32, i32) {
    %c0_i32 = arith.constant 0 : i32
    %c0_i32_0 = arith.constant 0 : i32
    %c0_i32_1 = arith.constant 0 : i32
    return %c0_i32, %c0_i32_0 : i32, i32
  }
  func.func @transform_3(%arg0: i32) -> (i32, i32) {
    %c0_i32 = arith.constant 0 : i32
    %c0_i32_0 = arith.constant 0 : i32
    %c0_i32_1 = arith.constant 0 : i32
    return %c0_i32, %c0_i32_0 : i32, i32
  }
  func.func @transform_4(%arg0: i32) -> (i32, i32) {
    %c0_i32 = arith.constant 0 : i32
    %c0_i32_0 = arith.constant 0 : i32
    %c0_i32_1 = arith.constant 0 : i32
    return %c0_i32, %c0_i32_0 : i32, i32
  }
  func.func @transform_5(%arg0: i32) -> (i32, i32) {
    %c0_i32 = arith.constant 0 : i32
    %c0_i32_0 = arith.constant 0 : i32
    %c0_i32_1 = arith.constant 0 : i32
    return %c0_i32, %c0_i32_0 : i32, i32
  }
  func.func @transform_6(%arg0: i32) -> (i32, i32) {
    %c0_i32 = arith.constant 0 : i32
    %c0_i32_0 = arith.constant 0 : i32
    %c0_i32_1 = arith.constant 0 : i32
    return %c0_i32, %c0_i32_0 : i32, i32
  }
  func.func @transform_7(%arg0: i32) -> (i32, i32) {
    %c0_i32 = arith.constant 0 : i32
    %c0_i32_0 = arith.constant 0 : i32
    return %arg0, %c0_i32 : i32, i32
  }
}

</mosaic_0001>

<bundles_post_ra>
// kernel: tpu_custom_call.1
= control target key start
LH: loop header
LB: loop body
LE: loop exit
PB: predicated region body
PF: predicated region fallthrough
CT: control target
= control target key end

     0   :  { %vm40_vm0 = vcmask 1043456   ;;  %v376_v2 = vmov 0.0   ;;  %vm377_vm1 = vmmov 0   ;;  %vm36_vm2 = vcmask 31744   ;;  %s465_s0 = inlined_call_operand.vmem [shape: f32[8,4], index: 0, kind: input, shape index: {}]   ;;  %s466_s1 = inlined_call_operand.vmem [shape: f32[4,32], index: 1, kind: input, shape index: {}]   ;;  %s467_s2 = inlined_call_operand.vmem [shape: f32[1,32], index: 2, kind: input, shape index: {}]   ;;  %s468_s3 = inlined_call_operand.vmem [shape: f32[32,16], index: 3, kind: input, shape index: {}]   ;;  %s469_s4 = inlined_call_operand.vmem [shape: f32[1,16], index: 4, kind: input, shape index: {}]   ;;  %s470_s5 = inlined_call_operand.vmem [shape: f32[16,128], index: 5, kind: input, shape index: {}]   ;;  %s471_s6 = inlined_call_operand.vmem [shape: f32[1,128], index: 6, kind: input, shape index: {}]   ;;  %s472_s7 = inlined_call_operand.hbm [shape: f32[8,128], index: 7, kind: output, shape index: {}]  }
   0x1   :  { %v28_v0 = vld [vmem:[%s466_s1] sm:$0xf]  ;;  %316 = vmatprep.subr.mxu0 %v376_v2  ;;  %318 = vmatprep.mubr.msk.f32.mxu0 %vm377_vm1, %v376_v2  ;;  %v116_v4 = vld [vmem:[%s468_s3 + $0x8] sm:$0xff]  ;;  %v378_v5 = vmov 0.0|0.0  }
   0x2   :  { %v27_v1 = vld [vmem:[%s465_s0] sm:$0xff]  ;;  %317 = vmatpush3.msk.msra.mxu0 %vm40_vm0, %v28_v0  ;;  %339 = vmatprep.subr.bf16.mxu1 %v378_v5 }
   0x3   :  { %v115_v3 = vld [vmem:[%s468_s3] sm:$0xff] }
   0x4   :  { %v340_v6 = vpack.c.bf16 %v116_v4, %v115_v3 }
   0x5   :  { %12 = vsyncpa [#allocation3], 0  ;;  %319 = vmatmul.mubr.msk.f32.vlgmr.msra.gmra.mrb[0].mxu0 %vm36_vm2, %v27_v1  ;;  %329 = vmatprep.mubr.msk.f32.mxu1 %vm377_vm1, %v376_v2  ;;  %v117_v7 = vld [vmem:[%s468_s3 + $0x10] sm:$0xff]  ;;  %v118_v8 = vld [vmem:[%s468_s3 + $0x18] sm:$0xff]  ;;  %vm126_vm3 = vcmask 261120   ;;  %vm210_vm4 = vcmask 130048  }
   0x6   :  { %341 = vmatpush3.bf16.msra.mxu1 %v340_v6  ;;  %345 = vmatprep.subr.bf16.mxu0 %v378_v5  ;;  %v343_v9 = vpack.c.bf16 %v118_v8, %v117_v7  ;;  %v299_v10 = vld [vmem:[%s467_s2] ss:$0 sm:$0xff]  ;;  %v202_v16 = vld [vmem:[%s470_s5 + $0x8] sm:$0xff]  ;;  %s379_s19 = smov [#allocation2]  }
   0x7   :  { %342 = vmatprep.subr.bf16.mxu1 %v378_v5  ;;  %336 = vmatprep.mubr.msk.f32.mxu0 %vm377_vm1, %v376_v2  ;;  %v201_v15 = vld [vmem:[%s470_s5] sm:$0xff]  ;;  %s291_s20 = sshll.u32 %s379_s19, 4  ;;  %s292_s20 = int_to_ptr.vmem [resolvable:$true] %s291_s20 }
   0x8   :  { %v346_v17 = vpack.c.bf16 %v202_v16, %v201_v15  ;;  %v302_v18 = vld [vmem:[%s469_s4] ss:$0 sm:$0xff]  ;;  %s352_s5 = scalar_lea.vmem %s292_s20, 128  ;;  %p357_p1 = scmp.lt.s32.totalorder %s292_s20, %s292_s20 }
   0x9   :  { %v304_v23 = vld [vmem:[%s471_s6] ss:$0 sm:$0xff]  ;;  %p353_p0 = scmp.ne.s32.totalorder %s292_s20, %s352_s5  ;;  %p358_p2 = scmp.lt.s32.totalorder %s352_s5, %s352_s5 }
   0xa   :  { %344 = vmatpush3.bf16.msra.mxu1 %v343_v9  ;;  %347 = vmatpush3.bf16.msra.mxu0 %v346_v17 }
   0xb   :  { %p359_p3 = por %p358_p2, %p357_p1 }
   0xd   :  { %p360_p4 = pnand %p359_p3, %p353_p0 }
  0xd8   :  { %v110_v11 = vpop.f32.mrb[0].mxu0 }
  0xd9   :  { %v111_v12 = vadd.f32 %v299_v10, %v110_v11  ;;  %v320_v13 = vpop.f32.mrb[1].mxu0 }
  0xdb   :  { %v114_v14 = vmax.f32 %v111_v12, 0.0 }
  0xdd   :  { %330 = vmatmul.mubr.msk.f32.vlgmr.msra.gmra.mrb[0].mxu1 %vm126_vm3, %v114_v14 }
 0x1b0   :  { %v196_v19 = vpop.f32.mrb[0].mxu1 }
 0x1b1   :  { %v197_v20 = vadd.f32 %v302_v18, %v196_v19  ;;  %v331_v21 = vpop.f32.mrb[1].mxu1 }
 0x1b3   :  { %v200_v22 = vmax.f32 %v197_v20, 0.0 }
 0x1b5   :  { %337 = vmatmul.mubr.msk.f32.vlgmr.msra.gmra.mrb[2].mxu0 %vm210_vm4, %v200_v22 }
 0x288   :  { %v280_v24 = vpop.f32.mrb[2].mxu0 }
 0x289   :  { %v281_v25 = vadd.f32 %v304_v23, %v280_v24  ;;  %v338_v26 = vpop.f32.mrb[3].mxu0 }
 0x28b   :  { %284 = vst [vmem:[#allocation2] sm:$0xff] %v281_v25 }
 0x28c   :  { %363 = shalt.err (!%p360_p4)
}
 0x28d   :  { %s364_s22 = scalar_lea.hbm %s472_s7, 128 }
 0x28e   :  { %p365_p5 = scmp.ne.s32.totalorder %s472_s7, %s364_s22  ;;  %p368_p6 = scmp.lt.u32.totalorder %s364_s22, %s472_s7 }
 0x290   :  { %p370_p7 = pnand %p368_p6, %p365_p5 }
 0x292   :  { %373 = shalt.err (!%p370_p7)
}
 0x293   :  { %294 = dma.vmem_to_hbm [thread:$0]  %s292_s20, 128, %s472_s7, [#allocation3]  }
 0x294   :  { %374 = dma.done.wait [#allocation3], 128  }
 0x295   :  { %375 = vsyncadd [#allocation3], 4294967168 }
 0x296   :  { %298 = vsyncpa [#allocation3], 1 }

</bundles_post_ra>
